<compile_context>
chip_gen: v6e
topology: v6e:2x2x1
jax: 0.10.0
libtpu: 0.0.40
codegen_flags: <defaults>
</compile_context>

<pallas_src>
import jax
import jax.numpy as jnp
from jax.experimental import pallas as pl
from jax.experimental.pallas import tpu as pltpu


_VMEM_LIMIT = 48 * 1024 * 1024           # leaves headroom on v7x's 64 MiB VMEM
_WEIGHT_BLOCK_BYTES = 8 * 1024 * 1024    # cap per weight tile (bf16, per buffer)


# ---------------------------------------------------------------------------
# Generic fused linear:  y = cast_bf16(x) @ W + b
#   x block (tm, K) f32/bf16, W (K, tn) bf16 (pre-transposed on the host),
#   b (1, tn) f32.  f32 accumulation; output dtype parameterized (bf16 for the
#   QKV slab, f32 for the final projection).
# ---------------------------------------------------------------------------
def _linear_kernel(x_ref, w_ref, b_ref, y_ref):
    # In-kernel cast: removes a standalone XLA HBM cast pass over the
    # activations (no-op when the input is already bf16).
    x = x_ref[...].astype(jnp.bfloat16)
    y = jnp.dot(x, w_ref[...], preferred_element_type=jnp.float32)
    y_ref[...] = (y + b_ref[...]).astype(y_ref.dtype)


def _linear(x2d, w_t, b, out_dtype):
    """x2d: (M, K); w_t: (K, N) bf16 pre-transposed; b: (N,) f32."""
    M, K = x2d.shape
    N = w_t.shape[1]

    tm = M if M <= 512 else 512

    # Bound the weight's VMEM footprint: tile N so the (K, tn) bf16 block stays
    # under _WEIGHT_BLOCK_BYTES even when C is large (review: a (C,3C) weight
    # at C=2048 is ~48 MiB and would blow v7x VMEM when double-buffered).
    tn = N
    if K * N * 2 > _WEIGHT_BLOCK_BYTES:
        tn = max(512, (_WEIGHT_BLOCK_BYTES // (K * 2)) // 128 * 128)
        tn = min(tn, N)

    nm = pl.cdiv(M, tm)
    nn = pl.cdiv(N, tn)

    # N-tile axis OUTER, M-tile axis INNER: the weight tile's block index is
    # constant across the inner M sweep, so each weight tile is DMA'd once.
    return pl.pallas_call(
        _linear_kernel,
        out_shape=jax.ShapeDtypeStruct((M, N), out_dtype),
        grid=(nn, nm),
        in_specs=[
            pl.BlockSpec((tm, K), lambda j, i: (i, 0)),   # activations
            pl.BlockSpec((K, tn), lambda j, i: (0, j)),   # weights (bf16)
            pl.BlockSpec((1, tn), lambda j, i: (0, j)),   # bias (f32)
        ],
        out_specs=pl.BlockSpec((tm, tn), lambda j, i: (i, j)),
        compiler_params=pltpu.CompilerParams(
            dimension_semantics=("parallel", "parallel"),
            vmem_limit_bytes=_VMEM_LIMIT),
    )(x2d, w_t, b.reshape(1, N))


# ---------------------------------------------------------------------------
# Attention: one grid step == one (batch, head, query-tile).
#   q is pre-scaled by 1/sqrt(D) (folded into the projection weights).
#   Scores contract over D with T as the lane axis; softmax in f32 using the
#   EUP approximate reciprocal; probs cast to bf16 only as the PV MXU operand
#   (and optionally for the probs writeback via `probs_dtype`).
# ---------------------------------------------------------------------------
def _attention_kernel(q_ref, k_ref, v_ref, p_ref, a_ref):
    q = q_ref[0, 0]                              # (tq, D) bf16 (pre-scaled)
    k = k_ref[0, 0]                              # (T,  D) bf16
    v = v_ref[0, 0]                              # (T,  D) bf16

    # scores = q @ k^T without an explicit in-kernel transpose.
    s = jax.lax.dot_general(q, k, (((1,), (1,)), ((), ())),
                            preferred_element_type=jnp.float32)  # (tq, T) f32

    m = jnp.max(s, axis=-1, keepdims=True)
    e = jnp.exp(s - m)
    denom = jnp.sum(e, axis=-1, keepdims=True)
    probs = e * pl.reciprocal(denom, approx=True)                # (tq, T) f32

    p_ref[0, 0] = probs.astype(p_ref.dtype)
    a_ref[0, 0] = jnp.dot(probs.astype(v.dtype), v,
                          preferred_element_type=jnp.float32
                          ).astype(a_ref.dtype)                  # (tq, D) bf16


def _attention(q, k, v, tq, probs_dtype):
    B, H, T, D = q.shape
    return pl.pallas_call(
        _attention_kernel,
        out_shape=(
            jax.ShapeDtypeStruct((B, H, T, T), probs_dtype),     # attn_probs
            jax.ShapeDtypeStruct((B, H, T, D), jnp.bfloat16),    # attn out
        ),
        grid=(B, H, pl.cdiv(T, tq)),
        in_specs=[
            pl.BlockSpec((1, 1, tq, D), lambda b, h, t: (b, h, t, 0)),
            pl.BlockSpec((1, 1, T, D), lambda b, h, t: (b, h, 0, 0)),
            pl.BlockSpec((1, 1, T, D), lambda b, h, t: (b, h, 0, 0)),
        ],
        out_specs=(
            pl.BlockSpec((1, 1, tq, T), lambda b, h, t: (b, h, t, 0)),
            pl.BlockSpec((1, 1, tq, D), lambda b, h, t: (b, h, t, 0)),
        ),
        # Keep all three axes parallel so v7x's 2 TensorCores split B*H.
        compiler_params=pltpu.CompilerParams(
            dimension_semantics=("parallel", "parallel", "parallel"),
            vmem_limit_bytes=_VMEM_LIMIT),
    )(q, k, v)


# ---------------------------------------------------------------------------
# Wrapper — host-side layout plumbing only.
# ---------------------------------------------------------------------------
def block_forward(x, params, n_heads, probs_dtype=jnp.float32):
    """x: (B, T, C) f32. params: wq/wk/wv/wo (C,C) and bq/bk/bv/bo (C,) f32.

    Set probs_dtype=jnp.bfloat16 on v5e to halve the O(T^2) probs writeback
    when the consumer tolerates bf16 attention probabilities.
    """
    B, T, C = x.shape
    assert C % n_heads == 0
    D = C // n_heads
    scale = 1.0 / (D ** 0.5)

    # Pre-transpose, fuse QKV into one (C, 3C) matrix, fold the softmax scale
    # into the q slice, and cast MXU weight operands to bf16.
    w_qkv_t = jnp.concatenate(
        [params["wq"].T * scale, params["wk"].T, params["wv"].T], axis=1
    ).astype(jnp.bfloat16)                                       # (C, 3C)
    b_qkv = jnp.concatenate(
        [params["bq"] * scale, params["bk"], params["bv"]])      # (3C,) f32
    wo_t = params["wo"].T.astype(jnp.bfloat16)                   # (C, C)

    x2d = x.reshape(B * T, C)                                    # f32; cast in-kernel

    # (1) fused QKV projection -> lane-dense (B*T, 3C) bf16 slab.
    qkv = _linear(x2d, w_qkv_t, b_qkv, jnp.bfloat16)

    # Split heads (bf16, half the transpose bytes of the previous f32 version).
    def split_heads(y2d):
        return y2d.reshape(B, T, n_heads, D).transpose(0, 2, 1, 3)

    q = split_heads(qkv[:, :C])            # (B,H,T,D) bf16, pre-scaled
    k = split_heads(qkv[:, C:2 * C])       # (B,H,T,D) bf16
    v = split_heads(qkv[:, 2 * C:])        # (B,H,T,D) bf16

    # (2) attention over (batch, head, query-tile).  tq re-derived for v7x's
    # 64 MiB VMEM: 256 up to T=4K, 128 beyond.
    if T <= 256:
        tq = T
    elif T <= 4096:
        tq = 256
    else:
        tq = 128
    probs, attn = _attention(q, k, v, tq, probs_dtype)

    # (3) output projection with full contraction depth K = C.
    attn2d = attn.transpose(0, 2, 1, 3).reshape(B * T, C)        # bf16
    out = _linear(attn2d, wo_t, params["bo"], jnp.float32).reshape(B, T, C)

    # Returned k/v upcast to f32 to match the module's API (the convert fuses
    # with its producing transpose in XLA); drop the cast to keep them bf16.
    return out, k.astype(jnp.float32), v.astype(jnp.float32), probs


# ---------------------------------------------------------------------------
# Pure-JAX reference (f32) and deterministic init.
# ---------------------------------------------------------------------------
def _reference(x, params, n_heads):
    B, T, C = x.shape
    D = C // n_heads

    def lin(w, b):
        return x @ w.T + b

    q = lin(params["wq"], params["bq"]).reshape(B, T, n_heads, D).transpose(0, 2, 1, 3)
    k = lin(params["wk"], params["bk"]).reshape(B, T, n_heads, D).transpose(0, 2, 1, 3)
    v = lin(params["wv"], params["bv"]).reshape(B, T, n_heads, D).transpose(0, 2, 1, 3)
    scores = jnp.einsum("bhtd,bhsd->bhts", q, k) / (D ** 0.5)
    probs = jax.nn.softmax(scores, axis=-1)
    attn = jnp.einsum("bhts,bhsd->bhtd", probs, v)
    attn = attn.transpose(0, 2, 1, 3).reshape(B, T, C)
    out = attn @ params["wo"].T + params["bo"]
    return out, k, v, probs


def init_params(key, d_model):
    bound = 1.0 / (d_model ** 0.5)
    keys = jax.random.split(key, 8)

    def u(k, shape):
        return jax.random.uniform(k, shape, jnp.float32, -bound, bound)

    return {
        "wq": u(keys[0], (d_model, d_model)), "bq": u(keys[1], (d_model,)),
        "wk": u(keys[2], (d_model, d_model)), "bk": u(keys[3], (d_model,)),
        "wv": u(keys[4], (d_model, d_model)), "bv": u(keys[5], (d_model,)),
        "wo": u(keys[6], (d_model, d_model)), "bo": u(keys[7], (d_model,)),
    }


if __name__ == "__main__":
    B, T, d_model, n_heads = 2, 8, 32, 4

    root = jax.random.PRNGKey(0)
    kx, kp = jax.random.split(root)
    x = jax.random.normal(kx, (B, T, d_model), jnp.float32)
    params = init_params(kp, d_model)

    fwd = jax.jit(block_forward, static_argnames="n_heads")
    out, k, v, probs = fwd(x, params, n_heads=n_heads)
    jax.block_until_ready((out, k, v, probs))

    ro, rk, rv, rp = _reference(x, params, n_heads)
    # bf16 MXU operands / bf16 QKV slab + approx reciprocal -> loosened
    # tolerances vs pure f32.
    tol = dict(atol=2e-2, rtol=2e-2)
    assert jnp.allclose(out, ro, **tol), float(jnp.max(jnp.abs(out - ro)))
    assert jnp.allclose(k, rk, **tol), float(jnp.max(jnp.abs(k - rk)))
    assert jnp.allclose(v, rv, **tol), float(jnp.max(jnp.abs(v - rv)))
    assert jnp.allclose(probs, rp, **tol), float(jnp.max(jnp.abs(probs - rp)))

    print("KERNEL_OK")
</pallas_src>

<mosaic_0001>
module attributes {stable_mosaic.version = 11 : i64} {
  func.func @_linear_kernel(%arg0: i32, %arg1: i32, %arg2: memref<16x32xf32, #tpu.memory_space<vmem>>, %arg3: memref<32x96xbf16, #tpu.memory_space<vmem>>, %arg4: memref<1x96xf32, #tpu.memory_space<vmem>>, %arg5: memref<16x96xbf16, #tpu.memory_space<vmem>>) attributes {dimension_semantics = [#tpu.dimension_semantics<parallel>, #tpu.dimension_semantics<parallel>], iteration_bounds = array<i64: 1, 1>, scalar_prefetch = 0 : i64, scratch_operands = 0 : i64, tpu.core_type = #tpu.core_type<tc>, window_params = [{transform_indices = @transform_0, window_bounds = array<i64: 16, 32>}, {transform_indices = @transform_1, window_bounds = array<i64: 32, 96>}, {transform_indices = @transform_2, window_bounds = array<i64: 1, 96>}, {transform_indices = @transform_3, window_bounds = array<i64: 16, 96>}]} {
    %c0 = arith.constant 0 : index
    %c0_0 = arith.constant 0 : index
    %0 = vector.load %arg2[%c0, %c0_0] : memref<16x32xf32, #tpu.memory_space<vmem>>, vector<16x32xf32>
    %1 = arith.truncf %0 : vector<16x32xf32> to vector<16x32xbf16>
    %c0_1 = arith.constant 0 : index
    %c0_2 = arith.constant 0 : index
    %2 = vector.load %arg3[%c0_1, %c0_2] : memref<32x96xbf16, #tpu.memory_space<vmem>>, vector<32x96xbf16>
    %cst = arith.constant dense<0.000000e+00> : vector<16x96xf32>
    %3 = tpu.matmul %1, %2, %cst {dimension_numbers = #tpu.dot_dimension_numbers<[1], [0], [0], [1], [0, 0, 1, 1], [], []>} : vector<16x32xbf16>, vector<32x96xbf16>, vector<16x96xf32> -> vector<16x96xf32>
    %c0_3 = arith.constant 0 : index
    %c0_4 = arith.constant 0 : index
    %4 = vector.load %arg4[%c0_3, %c0_4] : memref<1x96xf32, #tpu.memory_space<vmem>>, vector<1x96xf32>
    %5 = vector.broadcast %4 : vector<1x96xf32> to vector<16x96xf32>
    %6 = arith.addf %3, %5 : vector<16x96xf32>
    %7 = arith.truncf %6 : vector<16x96xf32> to vector<16x96xbf16>
    %c0_5 = arith.constant 0 : index
    %c0_6 = arith.constant 0 : index
    %8 = vector.load %arg5[%c0_5, %c0_6] : memref<16x96xbf16, #tpu.memory_space<vmem>>, vector<16x96xbf16>
    tpu.vector_store %arg5[%c0_5, %c0_6], %7 {strides = array<i32>} : memref<16x96xbf16, #tpu.memory_space<vmem>>, vector<16x96xbf16>,
    return
  }
  func.func @transform_0(%arg0: i32, %arg1: i32) -> (i32, i32) {
    %c0_i32 = arith.constant 0 : i32
    %c0_i32_0 = arith.constant 0 : i32
    return %arg1, %c0_i32 : i32, i32
  }
  func.func @transform_1(%arg0: i32, %arg1: i32) -> (i32, i32) {
    %c0_i32 = arith.constant 0 : i32
    %c0_i32_0 = arith.constant 0 : i32
    return %c0_i32, %arg0 : i32, i32
  }
  func.func @transform_2(%arg0: i32, %arg1: i32) -> (i32, i32) {
    %c0_i32 = arith.constant 0 : i32
    %c0_i32_0 = arith.constant 0 : i32
    return %c0_i32, %arg0 : i32, i32
  }
  func.func @transform_3(%arg0: i32, %arg1: i32) -> (i32, i32) {
    %c0_i32 = arith.constant 0 : i32
    return %arg1, %arg0 : i32, i32
  }
}

module attributes {stable_mosaic.version = 11 : i64} {
  func.func @_attention_kernel(%arg0: i32, %arg1: i32, %arg2: i32, %arg3: memref<1x1x8x8xbf16, #tpu.memory_space<vmem>>, %arg4: memref<1x1x8x8xbf16, #tpu.memory_space<vmem>>, %arg5: memref<1x1x8x8xbf16, #tpu.memory_space<vmem>>, %arg6: memref<1x1x8x8xf32, #tpu.memory_space<vmem>>, %arg7: memref<1x1x8x8xbf16, #tpu.memory_space<vmem>>) attributes {dimension_semantics = [#tpu.dimension_semantics<parallel>, #tpu.dimension_semantics<parallel>, #tpu.dimension_semantics<parallel>], iteration_bounds = array<i64: 2, 4, 1>, scalar_prefetch = 0 : i64, scratch_operands = 0 : i64, tpu.core_type = #tpu.core_type<tc>, window_params = [{transform_indices = @transform_0, window_bounds = array<i64: 1, 1, 8, 8>}, {transform_indices = @transform_1, window_bounds = array<i64: 1, 1, 8, 8>}, {transform_indices = @transform_2, window_bounds = array<i64: 1, 1, 8, 8>}, {transform_indices = @transform_3, window_bounds = array<i64: 1, 1, 8, 8>}, {transform_indices = @transform_4, window_bounds = array<i64: 1, 1, 8, 8>}]} {
    %c0 = arith.constant 0 : index
    %c0_0 = arith.constant 0 : index
    %c0_1 = arith.constant 0 : index
    %c0_2 = arith.constant 0 : index
    %0 = vector.load %arg3[%c0, %c0_0, %c0_1, %c0_2] : memref<1x1x8x8xbf16, #tpu.memory_space<vmem>>, vector<1x1x8x8xbf16>
    %1 = vector.shape_cast %0 : vector<1x1x8x8xbf16> to vector<8x8xbf16>
    %c0_3 = arith.constant 0 : index
    %c0_4 = arith.constant 0 : index
    %c0_5 = arith.constant 0 : index
    %c0_6 = arith.constant 0 : index
    %2 = vector.load %arg4[%c0_3, %c0_4, %c0_5, %c0_6] : memref<1x1x8x8xbf16, #tpu.memory_space<vmem>>, vector<1x1x8x8xbf16>
    %3 = vector.shape_cast %2 : vector<1x1x8x8xbf16> to vector<8x8xbf16>
    %c0_7 = arith.constant 0 : index
    %c0_8 = arith.constant 0 : index
    %c0_9 = arith.constant 0 : index
    %c0_10 = arith.constant 0 : index
    %4 = vector.load %arg5[%c0_7, %c0_8, %c0_9, %c0_10] : memref<1x1x8x8xbf16, #tpu.memory_space<vmem>>, vector<1x1x8x8xbf16>
    %5 = vector.shape_cast %4 : vector<1x1x8x8xbf16> to vector<8x8xbf16>
    %cst = arith.constant dense<0.000000e+00> : vector<8x8xf32>
    %6 = tpu.matmul %1, %3, %cst {dimension_numbers = #tpu.dot_dimension_numbers<[1], [1], [0], [0], [0, 0, 1, 0], [], []>} : vector<8x8xbf16>, vector<8x8xbf16>, vector<8x8xf32> -> vector<8x8xf32>
    %cst_11 = arith.constant dense<0xFF800000> : vector<8xf32>
    %7 = vector.multi_reduction <maximumf>, %6, %cst_11 [1] : vector<8x8xf32> to vector<8xf32>
    %8 = vector.shape_cast %7 : vector<8xf32> to vector<8x1xf32>
    %9 = vector.broadcast %8 : vector<8x1xf32> to vector<8x8xf32>
    %10 = arith.subf %6, %9 : vector<8x8xf32>
    %11 = math.exp %10 : vector<8x8xf32>
    %cst_12 = arith.constant dense<0.000000e+00> : vector<8xf32>
    %12 = vector.multi_reduction <add>, %11, %cst_12 [1] : vector<8x8xf32> to vector<8xf32>
    %13 = vector.shape_cast %12 : vector<8xf32> to vector<8x1xf32>
    %14 = tpu.reciprocal %13 {approx = true} : vector<8x1xf32> -> vector<8x1xf32>
    %15 = vector.broadcast %14 : vector<8x1xf32> to vector<8x8xf32>
    %16 = arith.mulf %11, %15 : vector<8x8xf32>
    %c0_13 = arith.constant 0 : index
    %c0_14 = arith.constant 0 : index
    %c0_15 = arith.constant 0 : index
    %c0_16 = arith.constant 0 : index
    %17 = vector.load %arg6[%c0_13, %c0_14, %c0_15, %c0_16] : memref<1x1x8x8xf32, #tpu.memory_space<vmem>>, vector<1x1x8x8xf32>
    %18 = vector.shape_cast %17 : vector<1x1x8x8xf32> to vector<8x8xf32>
    %19 = vector.shape_cast %16 : vector<8x8xf32> to vector<1x1x8x8xf32>
    tpu.vector_store %arg6[%c0_13, %c0_14, %c0_15, %c0_16], %19 {strides = array<i32>} : memref<1x1x8x8xf32, #tpu.memory_space<vmem>>, vector<1x1x8x8xf32>,
    %20 = arith.truncf %16 : vector<8x8xf32> to vector<8x8xbf16>
    %cst_17 = arith.constant dense<0.000000e+00> : vector<8x8xf32>
    %21 = tpu.matmul %20, %5, %cst_17 {dimension_numbers = #tpu.dot_dimension_numbers<[1], [0], [0], [1], [0, 0, 1, 1], [], []>} : vector<8x8xbf16>, vector<8x8xbf16>, vector<8x8xf32> -> vector<8x8xf32>
    %22 = arith.truncf %21 : vector<8x8xf32> to vector<8x8xbf16>
    %c0_18 = arith.constant 0 : index
    %c0_19 = arith.constant 0 : index
    %c0_20 = arith.constant 0 : index
    %c0_21 = arith.constant 0 : index
    %23 = vector.load %arg7[%c0_18, %c0_19, %c0_20, %c0_21] : memref<1x1x8x8xbf16, #tpu.memory_space<vmem>>, vector<1x1x8x8xbf16>
    %24 = vector.shape_cast %23 : vector<1x1x8x8xbf16> to vector<8x8xbf16>
    %25 = vector.shape_cast %22 : vector<8x8xbf16> to vector<1x1x8x8xbf16>
    tpu.vector_store %arg7[%c0_18, %c0_19, %c0_20, %c0_21], %25 {strides = array<i32>} : memref<1x1x8x8xbf16, #tpu.memory_space<vmem>>, vector<1x1x8x8xbf16>,
    return
  }
  func.func @transform_0(%arg0: i32, %arg1: i32, %arg2: i32) -> (i32, i32, i32, i32) {
    %c0_i32 = arith.constant 0 : i32
    %c0_i32_0 = arith.constant 0 : i32
    return %arg0, %arg1, %arg2, %c0_i32 : i32, i32, i32, i32
  }
  func.func @transform_1(%arg0: i32, %arg1: i32, %arg2: i32) -> (i32, i32, i32, i32) {
    %c0_i32 = arith.constant 0 : i32
    %c0_i32_0 = arith.constant 0 : i32
    %c0_i32_1 = arith.constant 0 : i32
    return %arg0, %arg1, %c0_i32, %c0_i32_0 : i32, i32, i32, i32
  }
  func.func @transform_2(%arg0: i32, %arg1: i32, %arg2: i32) -> (i32, i32, i32, i32) {
    %c0_i32 = arith.constant 0 : i32
    %c0_i32_0 = arith.constant 0 : i32
    %c0_i32_1 = arith.constant 0 : i32
    return %arg0, %arg1, %c0_i32, %c0_i32_0 : i32, i32, i32, i32
  }
  func.func @transform_3(%arg0: i32, %arg1: i32, %arg2: i32) -> (i32, i32, i32, i32) {
    %c0_i32 = arith.constant 0 : i32
    %c0_i32_0 = arith.constant 0 : i32
    return %arg0, %arg1, %arg2, %c0_i32 : i32, i32, i32, i32
  }
  func.func @transform_4(%arg0: i32, %arg1: i32, %arg2: i32) -> (i32, i32, i32, i32) {
    %c0_i32 = arith.constant 0 : i32
    %c0_i32_0 = arith.constant 0 : i32
    return %arg0, %arg1, %arg2, %c0_i32 : i32, i32, i32, i32
  }
}

module attributes {stable_mosaic.version = 11 : i64} {
  func.func @_linear_kernel(%arg0: i32, %arg1: i32, %arg2: memref<16x32xbf16, #tpu.memory_space<vmem>>, %arg3: memref<32x32xbf16, #tpu.memory_space<vmem>>, %arg4: memref<1x32xf32, #tpu.memory_space<vmem>>, %arg5: memref<16x32xf32, #tpu.memory_space<vmem>>) attributes {dimension_semantics = [#tpu.dimension_semantics<parallel>, #tpu.dimension_semantics<parallel>], iteration_bounds = array<i64: 1, 1>, scalar_prefetch = 0 : i64, scratch_operands = 0 : i64, tpu.core_type = #tpu.core_type<tc>, window_params = [{transform_indices = @transform_0, window_bounds = array<i64: 16, 32>}, {transform_indices = @transform_1, window_bounds = array<i64: 32, 32>}, {transform_indices = @transform_2, window_bounds = array<i64: 1, 32>}, {transform_indices = @transform_3, window_bounds = array<i64: 16, 32>}]} {
    %c0 = arith.constant 0 : index
    %c0_0 = arith.constant 0 : index
    %0 = vector.load %arg2[%c0, %c0_0] : memref<16x32xbf16, #tpu.memory_space<vmem>>, vector<16x32xbf16>
    %c0_1 = arith.constant 0 : index
    %c0_2 = arith.constant 0 : index
    %1 = vector.load %arg3[%c0_1, %c0_2] : memref<32x32xbf16, #tpu.memory_space<vmem>>, vector<32x32xbf16>
    %cst = arith.constant dense<0.000000e+00> : vector<16x32xf32>
    %2 = tpu.matmul %0, %1, %cst {dimension_numbers = #tpu.dot_dimension_numbers<[1], [0], [0], [1], [0, 0, 1, 1], [], []>} : vector<16x32xbf16>, vector<32x32xbf16>, vector<16x32xf32> -> vector<16x32xf32>
    %c0_3 = arith.constant 0 : index
    %c0_4 = arith.constant 0 : index
    %3 = vector.load %arg4[%c0_3, %c0_4] : memref<1x32xf32, #tpu.memory_space<vmem>>, vector<1x32xf32>
    %4 = vector.broadcast %3 : vector<1x32xf32> to vector<16x32xf32>
    %5 = arith.addf %2, %4 : vector<16x32xf32>
    %c0_5 = arith.constant 0 : index
    %c0_6 = arith.constant 0 : index
    %6 = vector.load %arg5[%c0_5, %c0_6] : memref<16x32xf32, #tpu.memory_space<vmem>>, vector<16x32xf32>
    tpu.vector_store %arg5[%c0_5, %c0_6], %5 {strides = array<i32>} : memref<16x32xf32, #tpu.memory_space<vmem>>, vector<16x32xf32>,
    return
  }
  func.func @transform_0(%arg0: i32, %arg1: i32) -> (i32, i32) {
    %c0_i32 = arith.constant 0 : i32
    %c0_i32_0 = arith.constant 0 : i32
    return %arg1, %c0_i32 : i32, i32
  }
  func.func @transform_1(%arg0: i32, %arg1: i32) -> (i32, i32) {
    %c0_i32 = arith.constant 0 : i32
    %c0_i32_0 = arith.constant 0 : i32
    return %c0_i32, %arg0 : i32, i32
  }
  func.func @transform_2(%arg0: i32, %arg1: i32) -> (i32, i32) {
    %c0_i32 = arith.constant 0 : i32
    %c0_i32_0 = arith.constant 0 : i32
    return %c0_i32, %arg0 : i32, i32
  }
  func.func @transform_3(%arg0: i32, %arg1: i32) -> (i32, i32) {
    %c0_i32 = arith.constant 0 : i32
    return %arg1, %arg0 : i32, i32
  }
}

</mosaic_0001>

<bundles_post_ra>
// kernel: block_forward.4
= control target key start
LH: loop header
LB: loop body
LE: loop exit
PB: predicated region body
PF: predicated region fallthrough
CT: control target
= control target key end

     0   :  { %s1022_s0 = inlined_call_operand.vmem [shape: bf16[2,4,8,8], index: 0, kind: input, shape index: {}]   ;;  %s1023_s1 = inlined_call_operand.vmem [shape: bf16[2,4,8,8], index: 1, kind: input, shape index: {}]   ;;  %s1024_s2 = inlined_call_operand.vmem [shape: bf16[2,4,8,8], index: 2, kind: input, shape index: {}]   ;;  %s1025_s3 = inlined_call_operand.hbm [shape: f32[2,4,8,8], index: 3, kind: output, shape index: {0}]   ;;  %s1026_s4 = inlined_call_operand.vmem [shape: bf16[2,4,8,8], index: 4, kind: output, shape index: {1}]  }
   0x1   :  { %1027 = sst [smem:[#allocation5_spill]] %s1022_s0 }
   0x2   :  { %1028 = sst [smem:[#allocation6_spill]] %s1023_s1 }
   0x3   :  { %10 = vsyncpa [#allocation3], 0 }
   0x4   :  { %12 = vsyncpa [#allocation3 + $0x1], 0  ;;  %s877_s15 = smov 0   ;;  %s879_s16 = smov 0  }
   0x5   :  { %s881_s17 = smov 0   ;;  %s883_s18 = smov 0  }
   0x6   :  { %s885_s19 = smov 0   ;;  %s887_s20 = smov 0  }
   0x7   :  { %s889_s21 = smov 0   ;;  %s891_s22 = smov 0  }
   0x8 LB: > { %s641_s23 = sadd.s32 4294967295, %s847_s22   ;;  %s642_s24 = sadd.s32 4294967294, %s847_s22   ;;  %s847_s22 = sphi %s891_s22, %s18_s22   ;;  %s843_s21 = sphi %s889_s21, %s1039_s21   ;;  %s839_s20 = sphi %s887_s20, %s1038_s20   ;;  %s835_s19 = sphi %s885_s19, %s1037_s19   ;;  %s831_s18 = sphi %s883_s18, %s1036_s18   ;;  %s827_s17 = sphi %s881_s17, %s1035_s17   ;;  %s823_s16 = sphi %s879_s16, %s1034_s16   ;;  %s819_s15 = sphi %s877_s15, %s1033_s15  }
   0x9   : > { %s33_s25 = sadd.s32 1, %s839_s20  ;;  %s37_s26 = sadd.s32 1, %s843_s21 }
   0xa   : > { %p35_p0 = scmp.ge.s32.totalorder %s33_s25, 4  ;;  %p144_p1 = scmp.ne.s32.totalorder %s827_s17, %s823_s16 }
   0xb   : > { %p145_p2 = scmp.eq.s32.totalorder %s641_s23, 7  ;;  %p150_p5 = scmp.ne.s32.totalorder %s823_s16, %s819_s15 }
   0xc   : > { %s1041_s25 = smov (%p35_p0, %s33_s25), 0  ;;  %s1043_s26 = smov (!%p35_p0, %s37_s26), %s843_s21 }
   0xd   : > { %s128_s27 = ssub.s32 %s839_s20, %s1041_s25  ;;  %p928_p3 = por %p145_p2, %p144_p1 }
   0xe   : > { %p39_p4 = scmp.ge.s32.totalorder %s1043_s26, 2  ;;  %p151_p6 = scmp.eq.s32.totalorder %s642_s24, 7 }
   0xf   : > { %p645_p7 = scmp.ge.s32.totalorder %s847_s22, 1  ;;  %p235_p9 = scmp.lt.s32.totalorder %s847_s22, 9 }
  0x10   : > { %s1045_s26 = smov (%p39_p4, %s1043_s26), 0  ;;  %p937_p8 = por %p151_p6, %p150_p5 }
  0x11   : > { %s127_s30 = ssub.s32 %s843_s21, %s1045_s26  ;;  %s134_s5 = sadd.s32 1, %s827_s17 }
  0x12   : > { %s129_s6 = sor.u32 %s128_s27, %s127_s30  ;;  %p236_p10 = pnand %p645_p7, %p235_p9 }
  0x13   : > { %p132_p11 = scmp.eq.s32.totalorder %s129_s6, 0  ;;  %p294_p12 = scmp.lt.s32.totalorder (!%p236_p10), %s835_s19, 1 }
  0x14   : > { %239 = sbr.rel (%p236_p10) target bundleno = 746 (0x2ea), region = 32  ;;  %p296_p13 = scmp.lt.s32.totalorder (!%p236_p10), %s831_s18, 3 }
  0x15   : > { %s946_s7 = scalar_select %p132_p11, %s827_s17, %s134_s5  }
  0x16   : > { %s1031_s1 = sld [smem:[#allocation6_spill]] (!%p236_p10)  ;;  %s658_s13 = sshll.u32 (!%p236_p10), %s835_s19, 2 }
  0x17   : > { %s1032_s0 = sld [smem:[#allocation5_spill]] (!%p236_p10)  ;;  %s470_s14 = sadd.s32 (!%p236_p10), %s831_s18, %s658_s13 }
  0x19   : > { %v849_v0 = vmov 0.0   ;;  %vm850_vm0 = vmmov 0   ;;  %s295_s8 = scalar_select %p294_p12, %s835_s19, 1  ;;  %vm336_vm1 = vcmask 64512   ;;  %vm399_vm2 = vcmask 1043456  }
  0x1a   : > { %666 = vmatprep.subr.bf16.mxu0 %v849_v0  ;;  %668 = vmatprep.mubr.msk.bf16.mxu0 %vm850_vm0, %v849_v0  ;;  %s297_s9 = scalar_select %p296_p13, %s831_s18, 3 }
  0x1b   : > { %672 = vmatprep.subr.bf16.mxu1 %v849_v0  ;;  %674 = vmatprep.mubr.msk.bf16.mxu1 %vm850_vm0, %v849_v0  ;;  %s647_s10 = sshll.u32 %s295_s8, 2 }
  0x1c   : > { %s302_s11 = sadd.s32 %s647_s10, %s297_s9  ;;  %s278_s9 = sand.u32 1, %s823_s16  }
  0x1d   : > { %s952_s12 = sshll.u32 %s302_s11, 2  ;;  %s646_s10 = sshll.u32 %s278_s9, 3 }
  0x1e   : > { %s312_s23 = scalar_lea.vmem %s1031_s1, %s952_s12  ;;  %s304_s30 = scalar_lea.vmem %s1032_s0, %s952_s12 }
  0x1f   : > { %v334_v1 = vld [vmem:[%s312_s23] sm:$0xf]  ;;  %s320_s8 = scalar_lea.vmem %s1024_s2, %s952_s12  ;;  %s280_s11 = scalar_lea.vmem [#allocation2], %s646_s10 }
  0x20   : > { %v341_v2 = vsel %vm336_vm1, %v334_v1, 0  ;;  %v333_v3 = vld [vmem:[%s304_s30] sm:$0xf]  ;;  %s659_s23 = sshll.u32 %s470_s14, 7  ;;  %s474_s24 = sshll.u32 %s280_s11, 4  ;;  %s475_s24 = int_to_ptr.vmem [resolvable:$true] %s474_s24 }
  0x21   : > { %667 = vmatpush3.bf16.xpose.msra.mxu0 %v341_v2  ;;  %v335_v14 = vld [vmem:[%s320_s8] sm:$0xf]  ;;  %s472_s5 = scalar_lea.hbm %s1025_s3, %s659_s23  ;;  %s447_s6 = scalar_lea.sflag [#allocation3], %s278_s9 }
  0x22   : > { %v401_v15 = vsel %vm399_vm2, %v335_v14, 0  ;;  %s755_s8 = scalar_lea.vmem %s475_s24, 128  ;;  %s851_s10 = smov [#allocation2]  }
  0x23   : > { %673 = vmatpush3.bf16.msra.mxu1 %v401_v15  ;;  %p756_p0 = scmp.ne.s32.totalorder %s475_s24, %s755_s8  ;;  %s759_s0 = sshll.u32 %s851_s10, 4  ;;  %s760_s0 = int_to_ptr.vmem [resolvable:$false] %s759_s0 }
  0x24   : > { %s761_s1 = scalar_lea.vmem %s760_s0, 256  ;;  %p762_p4 = scmp.lt.s32.totalorder %s475_s24, %s760_s0 }
  0x25   : > { %p757_p1 = pnand %p756_p0, %p928_p3  ;;  %p763_p5 = scmp.lt.s32.totalorder %s761_s1, %s755_s8 }
  0x27   : > { %p758_p2 = pneg %p757_p1  ;;  %p764_p6 = por %p763_p5, %p762_p4 }
  0x28   : > { %669 = vmatmul.mubr.msk.bf16.vlgmr.msra.gmra.mxu0 %vm336_vm1, %v333_v3 }
  0x29   : > { %p765_p7 = pnand %p764_p6, %p758_p2 }
  0xe8   : > { %v377_v4 = vpop.f32.mrf.mxu0 }
  0xe9   : > { %v383_v5 = vsel %vm336_vm1, %v377_v4, -inf }
  0xea   : > { %384 = vmax.xlane.f32.xlu0 %v383_v5  ;;  %v670_v6 = vpop.f32.mrf.mxu0 }
  0xec   : > { %v380_v7 = vpop.f32.mrf.mxu0 }
  0xee   : > { %v671_v8 = vpop.f32.mrf.mxu0 }
 0x173   : > { %v385_v9 = vpop.xlane.xlu0 %384 }
 0x174   : > { %v386_v10 = vsub.f32 %v377_v4, %v385_v9 }
 0x176   : > { %v387_v11 = vmul.f32 1.442695, %v386_v10 }
 0x178   : > { %751 = vpow2.f32 %v387_v11 }
 0x185   : > { %v752_v12 = vpop.eup %751 }
 0x186   : > { %v389_v13 = vsel %vm336_vm1, %v752_v12, 0.0 }
 0x187   : > { %390 = vadd.xlane.f32.xlu0 %v389_v13 }
 0x210   : > { %v391_v16 = vpop.xlane.xlu0 %390 }
 0x211   : > { %753 = vrcp.f32 %v391_v16 }
 0x21e   : > { %v754_v17 = vpop.eup %753 }
 0x21f   : > { %v393_v18 = vmul.f32 %v754_v17, %v752_v12 }
 0x221   : > { %v395_v19 = vpack.c.bf16 %v393_v18, %v393_v18  ;;  %394 = vst.msk [vmem:[%s280_s11] sm:$0xff] %vm336_vm1, %v393_v18 }
 0x223   : > { %675 = vmatmul.mubr.msk.bf16.vlgmr.msra.gmra.mxu1 %vm336_vm1, %v395_v19 }
 0x224   : > { %768 = shalt.err (!%p765_p7)
}
 0x225   : > { %s769_s18 = scalar_lea.hbm %s472_s5, 128  ;;  %s773_s11 = scalar_lea.hbm %s1025_s3, 1024 }
 0x226   : > { %p770_p9 = scmp.ne.s32.totalorder %s472_s5, %s769_s18  ;;  %p774_p12 = scmp.lt.s32.totalorder %s472_s5, %s1025_s3 }
 0x227   : > { %p775_p13 = scmp.lt.s32.totalorder %s773_s11, %s769_s18 }
 0x228   : > { %p771_p10 = pnand %p770_p9, %p928_p3 }
 0x229   : > { %p776_p0 = por %p775_p13, %p774_p12 }
 0x22a   : > { %p772_p11 = pneg %p771_p10 }
 0x22c   : > { %p777_p1 = pnand %p776_p0, %p772_p11 }
 0x22e   : > { %780 = shalt.err (!%p777_p1)
}
 0x22f   : > { %678 = dma.vmem_to_hbm [thread:$0]  (%p928_p3), %s475_s24, 128, %s472_s5, %s447_s6   ;;  %vm444_vm3 = vcmask 60416  }
 0x230   : > { %s331_s23 = scalar_lea.vmem %s1026_s4, %s952_s12 }
 0x2e3   : > { %v437_v20 = vpop.f32.mrf.mxu1 }
 0x2e4   : > { %v443_v21 = vpack.c.bf16 %v437_v20, %v437_v20 }
 0x2e5   : > { %v676_v22 = vpop.f32.mrf.mxu1 }
 0x2e6   : > { %445 = vst.msk [vmem:[%s331_s23] sm:$0xf] %vm444_vm3, %v443_v21 }
 0x2e7   : > { %v440_v23 = vpop.f32.mrf.mxu1 }
 0x2e9   : > { %v677_v24 = vpop.f32.mrf.mxu1 }
 0x2ea PF: > { %p684_p2 = scmp.ge.s32.totalorder %s847_s22, 2  ;;  %s489_s27 = sand.u32 1, %s819_s15  }
 0x2eb   : > { %s490_s28 = scalar_lea.sflag [#allocation3], %s489_s27 }
 0x2ec   : > { %p681_p4 = pnand %p684_p2, %p937_p8 }
 0x2ee   : > { %p682_p3 = pneg %p681_p4 }
 0x2f0   : > { %814 = dma.done.wait (%p682_p3), %s490_s28, 128  }
 0x2f1   : > { %816 = vsyncadd (%p682_p3), %s490_s28, 4294967168  ;;  %s18_s22 = sadd.s32 1, %s847_s22   ;;  %s1033_s15 = smov %s823_s16 }
 0x2f2   : > { %p15_p5 = scmp.ge.s32.totalorder %s18_s22, 10   ;;  %s1034_s16 = smov %s827_s17 }
 0x2f3   : > { %s1035_s17 = smov %s946_s7  ;;  %s1036_s18 = smov %s839_s20 }
 0x2f4   : > { %s1037_s19 = smov %s843_s21  ;;  %s1038_s20 = smov %s1041_s25 }
 0x2f5   : > { %s1039_s21 = smov %s1045_s26  ;;  %17 = sbr.rel (!%p15_p5) target bundleno = 8 (0x8), region = 85 }
 0x2fa   :  { %509 = vsyncpa [#allocation3], 1 }
 0x2fb   :  { %511 = vsyncpa [#allocation3 + $0x1], 1 }

// kernel: block_forward.3
= control target key start
LH: loop header
LB: loop body
LE: loop exit
PB: predicated region body
PF: predicated region fallthrough
CT: control target
= control target key end

     0   :  { %v124_v0 = vmov 0.0   ;;  %vm125_vm0 = vmmov 0   ;;  %vm41_vm1 = vcmask 261120   ;;  %vm94_vm2 = vcmask 781312   ;;  %s167_s1 = inlined_call_operand.vmem [shape: bf16[32,96], index: 1, kind: input, shape index: {}]   ;;  %s168_s0 = inlined_call_operand.vmem [shape: f32[16,32], index: 0, kind: input, shape index: {}]   ;;  %s169_s2 = inlined_call_operand.vmem [shape: f32[1,96], index: 2, kind: input, shape index: {}]   ;;  %s170_s3 = inlined_call_operand.vmem [shape: bf16[16,96], index: 3, kind: output, shape index: {}]  }
   0x1   :  { %112 = vmatprep.subr.bf16.mxu0 %v124_v0  ;;  %v122_v1 = vld [vmem:[%s167_s1 + $0x8] sm:$0xff]   ;;  %116 = vmatprep.mubr.msk.bf16.mxu0 %vm125_vm0, %v124_v0  ;;  %v123_v2 = vld [vmem:[%s167_s1] sm:$0xff]  }
   0x2   :  { %113 = vmatpush3.bf16.msra.mxu0 %v122_v1  ;;  %v15_v3 = vld [vmem:[%s168_s0] sm:$0xff]  ;;  %v16_v4 = vld [vmem:[%s168_s0 + $0x8] sm:$0xff] }
   0x3   :  { %114 = vmatprep.subr.bf16.mxu0 %v124_v0  ;;  %v17_v5 = vpack.c.bf16 %v16_v4, %v15_v3  ;;  %v101_v6 = vld [vmem:[%s169_s2] ss:$0 sm:$0xff] }
   0x6   :  { %115 = vmatpush3.bf16.msra.mxu0 %v123_v2 }
   0x9   :  { %117 = vmatmul.mubr.msk.bf16.vlgmr.msra.gmra.mxu0 %vm41_vm1, %v17_v5 }
  0xc9   :  { %v79_v7 = vpop.f32.mrf.mxu0 }
  0xca   :  { %v80_v8 = vadd.f32 %v101_v6, %v79_v7 }
  0xcb   :  { %v118_v9 = vpop.f32.mrf.mxu0 }
  0xcc   :  { %v107_v10 = vpack.c.bf16 %v80_v8, %v80_v8 }
  0xcd   :  { %v82_v11 = vpop.f32.mrf.mxu0 }
  0xce   :  { %95 = vst.msk [vmem:[%s170_s3] sm:$0xf] %vm94_vm2, %v107_v10  ;;  %v83_v12 = vadd.f32 %v101_v6, %v82_v11 }
  0xcf   :  { %v119_v13 = vpop.f32.mrf.mxu0 }
  0xd0   :  { %v108_v14 = vpack.c.bf16 %v83_v12, %v83_v12 }
  0xd2   :  { %96 = vst.msk [vmem:[%s170_s3 + $0x4] sm:$0xf] %vm94_vm2, %v108_v14 }

// kernel: block_forward.5
= control target key start
LH: loop header
LB: loop body
LE: loop exit
PB: predicated region body
PF: predicated region fallthrough
CT: control target
= control target key end

     0   :  { %v155_v1 = vmov 0.0   ;;  %vm156_vm0 = vmmov 0   ;;  %s195_s0 = inlined_call_operand.vmem [shape: bf16[16,32], index: 0, kind: input, shape index: {}]   ;;  %s196_s1 = inlined_call_operand.vmem [shape: bf16[32,32], index: 1, kind: input, shape index: {}]   ;;  %s197_s2 = inlined_call_operand.vmem [shape: f32[1,32], index: 2, kind: input, shape index: {}]   ;;  %s198_s3 = inlined_call_operand.hbm [shape: f32[16,32], index: 3, kind: output, shape index: {}]  }
   0x1   :  { %v130_v0 = vld [vmem:[%s196_s1 + $0x8] sm:$0xff]   ;;  %117 = vmatprep.subr.bf16.mxu0 %v155_v1  ;;  %v131_v2 = vld [vmem:[%s196_s1] sm:$0xff]   ;;  %121 = vmatprep.mubr.msk.bf16.mxu0 %vm156_vm0, %v155_v1 }
   0x2   :  { %118 = vmatpush3.bf16.msra.mxu0 %v130_v0 }
   0x3   :  { %119 = vmatprep.subr.bf16.mxu0 %v155_v1 }
   0x4   :  { %8 = vsyncpa [#allocation3], 0  ;;  %v132_v3 = vld [vmem:[%s195_s0] sm:$0xff]   ;;  %vm46_vm1 = vcmask 261120   ;;  %s157_s20 = smov [#allocation2]  }
   0x5   :  { %v109_v4 = vld [vmem:[%s197_s2] ss:$0 sm:$0xff]  ;;  %s98_s21 = sshll.u32 %s157_s20, 4  ;;  %s99_s21 = int_to_ptr.vmem [resolvable:$true] %s98_s21 }
   0x6   :  { %120 = vmatpush3.bf16.msra.mxu0 %v131_v2  ;;  %s133_s1 = scalar_lea.vmem %s99_s21, 256  ;;  %p138_p1 = scmp.lt.s32.totalorder %s99_s21, %s99_s21 }
   0x7   :  { %p134_p0 = scmp.ne.s32.totalorder %s99_s21, %s133_s1  ;;  %p139_p2 = scmp.lt.s32.totalorder %s133_s1, %s133_s1 }
   0x9   :  { %122 = vmatmul.mubr.msk.bf16.vlgmr.msra.gmra.mxu0 %vm46_vm1, %v132_v3  ;;  %p140_p3 = por %p139_p2, %p138_p1 }
   0xb   :  { %p141_p4 = pnand %p140_p3, %p134_p0 }
  0xc9   :  { %v84_v5 = vpop.f32.mrf.mxu0 }
  0xca   :  { %v85_v6 = vadd.f32 %v109_v4, %v84_v5 }
  0xcb   :  { %v123_v7 = vpop.f32.mrf.mxu0 }
  0xcc   :  { %91 = vst.msk [vmem:[#allocation2] sm:$0xff] %vm46_vm1, %v85_v6 }
  0xcd   :  { %v87_v8 = vpop.f32.mrf.mxu0 }
  0xce   :  { %v88_v9 = vadd.f32 %v109_v4, %v87_v8 }
  0xcf   :  { %v124_v10 = vpop.f32.mrf.mxu0 }
  0xd0   :  { %92 = vst.msk [vmem:[#allocation2 + $0x8] sm:$0xff] %vm46_vm1, %v88_v9 }
  0xd1   :  { %144 = shalt.err (!%p141_p4)
}
  0xd2   :  { %s158_s0 = smov 128   ;;  %s159_s2 = smov 8  }
  0xd3   :  { %104 = dma.vmem_to_hbm [thread:$0]  %s99_s21, 256, %s198_s3, [#allocation3], %s158_s0, %s158_s0, %s159_s2  }
  0xd4   :  { %153 = dma.done.wait [#allocation3], 256  }
  0xd5   :  { %154 = vsyncadd [#allocation3], 4294967040 }
  0xd6   :  { %108 = vsyncpa [#allocation3], 1 }

</bundles_post_ra>
